<compile_context>
chip_gen: v7x
topology: tpu7x:2x2x1
jax: 0.10.0
libtpu: 0.0.40
codegen_flags: <defaults>
</compile_context>

<pallas_src>
import jax
import jax.numpy as jnp
from jax import lax
from jax.experimental import pallas as pl
from jax.experimental.pallas import tpu as pltpu


# Flat parameter layout (row-major, weights stored as [in, out]):
#   w1: (8, 5) -> 0..39 | b1: (5,) -> 40..44 | w2: (5, 5) -> 45..69
#   b2: (5,)  -> 70..74 | w3: (5, 1) -> 75..79 | b3: (1,) -> 80
_W1, _B1, _W2, _B2, _W3, _B3 = 0, 40, 45, 70, 75, 80
_N_PARAMS = 81

_CH = 8        # sublanes per inner compute chunk -> every value is one vreg
_LANES = 128   # lane width


def mlp_kernel(p_ref, x_ref, o_ref):
    """p_ref: (81,) f32 SMEM.  x_ref: (8, S, 128) f32 VMEM.  o_ref: (S, 128) f32 VMEM."""
    S = o_ref.shape[0]  # static: TB // 128, a multiple of _CH

    # Hoist all 81 scalar SMEM reads out of the chunk loop.
    w1 = [[p_ref[_W1 + k * 5 + j] for j in range(5)] for k in range(8)]
    b1 = [p_ref[_B1 + j] for j in range(5)]
    w2 = [[p_ref[_W2 + k * 5 + j] for j in range(5)] for k in range(5)]
    b2 = [p_ref[_B2 + j] for j in range(5)]
    w3 = [p_ref[_W3 + k] for k in range(5)]
    b3 = p_ref[_B3]

    def chunk(c, carry):
        rows = pl.ds(pl.multiple_of(c * _CH, _CH), _CH)

        # Layer 1: h1[j] = relu(sum_k x[k] * w1[k, j] + b1[j])
        x0 = x_ref[0, rows, :]
        h1 = [x0 * w1[0][j] + b1[j] for j in range(5)]
        for k in range(1, 8):
            xk = x_ref[k, rows, :]
            for j in range(5):
                h1[j] = h1[j] + xk * w1[k][j]
        h1 = [jnp.maximum(h, 0.0) for h in h1]

        # Layer 2: h2[j] = relu(sum_k h1[k] * w2[k, j] + b2[j])
        h2 = [h1[0] * w2[0][j] + b2[j] for j in range(5)]
        for k in range(1, 5):
            for j in range(5):
                h2[j] = h2[j] + h1[k] * w2[k][j]
        h2 = [jnp.maximum(h, 0.0) for h in h2]

        # Layer 3: out = sum_k h2[k] * w3[k] + b3
        out = h2[0] * w3[0] + b3
        for k in range(1, 5):
            out = out + h2[k] * w3[k]

        o_ref[rows, :] = out.astype(o_ref.dtype)
        return carry

    lax.fori_loop(0, S // _CH, chunk, 0, unroll=False)


def _round_up(a, b):
    return (a + b - 1) // b * b


def pack_params(p):
    """Pack all weights/biases into one flat (81,) f32 vector (kernel's SMEM layout)."""
    return jnp.concatenate([
        p["w1"].reshape(-1),  # (8, 5) -> 40
        p["b1"].reshape(-1),  # 5
        p["w2"].reshape(-1),  # (5, 5) -> 25
        p["b2"].reshape(-1),  # 5
        p["w3"].reshape(-1),  # (5, 1) -> 5
        p["b3"].reshape(-1),  # 1
    ]).astype(jnp.float32)


def mynet_forward(x_fm, params, *, tile_batch=131072):
    """Forward pass.  x_fm: feature-major (8, B) f32 (batch on the trailing axis)."""
    F, B = x_fm.shape
    assert F == 8
    flat = pack_params(params)
    assert flat.shape == (_N_PARAMS,)

    # Batch tiling: TB samples per grid step; TB a multiple of 1024 so the block
    # shape (TB//128, 128) satisfies the (8, 128) tiling rule.
    unit = 8 * _LANES  # 1024
    Bp0 = _round_up(max(B, unit), unit)
    TB = min(_round_up(tile_batch, unit), Bp0)
    Bp = _round_up(Bp0, TB)
    n_tiles = Bp // TB

    xf = x_fm.astype(jnp.float32)
    if Bp != B:
        # Producers that already supply a TB-multiple batch skip this pad entirely.
        xf = jnp.pad(xf, ((0, 0), (0, Bp - B)))
    # Free (contiguous) reshape: batch folded onto (sublane, lane).
    x3 = xf.reshape(8, Bp // _LANES, _LANES)

    # Double-buffered VMEM traffic: 2 * (x tile + out tile) = 72 * TB bytes.
    # Floor 16 MiB (never below any generation's default), cap 48 MiB (under v7x
    # physical 64 MiB) so a v6e-tuned tile can't silently OOM on v7x / v5e.
    vmem_needed = 2 * (8 + 1) * TB * 4
    vmem_limit = min(max(vmem_needed + (4 << 20), 16 << 20), 48 << 20)

    out = pl.pallas_call(
        mlp_kernel,
        out_shape=jax.ShapeDtypeStruct((Bp // _LANES, _LANES), jnp.float32),
        grid_spec=pltpu.PrefetchScalarGridSpec(
            num_scalar_prefetch=0,
            grid=(n_tiles,),
            in_specs=[
                # Packed params: one tiny SMEM-resident operand (scalar reads).
                pl.BlockSpec(memory_space=pltpu.MemorySpace.SMEM),
                # x tiles: (8, TB//128, 128), double-buffered over the batch grid.
                pl.BlockSpec((8, TB // _LANES, _LANES), lambda i: (0, i, 0)),
            ],
            out_specs=pl.BlockSpec((TB // _LANES, _LANES), lambda i: (i, 0)),
        ),
        compiler_params=pltpu.CompilerParams(
            # TODO(synk): on v7x verify "parallel" actually shards batch tiles
            # across both TensorCores; if not, switch this axis to CORE_PARALLEL.
            dimension_semantics=("parallel",),
            vmem_limit_bytes=vmem_limit,
        ),
    )(flat, x3)

    return out.reshape(Bp)[:B].reshape(B, 1)


def mynet_forward_batch_major(x, params, **kw):
    """Convenience wrapper for PyTorch-style (B, 8) input (pays one transpose pass)."""
    return mynet_forward(x.T, params, **kw)


def init_params(key):
    """Deterministic init matching nn.Linear shapes (weights stored as (in, out))."""
    ks = jax.random.split(key, 6)

    def linear(kw, kb, fan_in, fan_out):
        bound = 1.0 / jnp.sqrt(jnp.float32(fan_in))
        w = jax.random.uniform(kw, (fan_in, fan_out), jnp.float32, -bound, bound)
        b = jax.random.uniform(kb, (fan_out,), jnp.float32, -bound, bound)
        return w, b

    w1, b1 = linear(ks[0], ks[1], 8, 5)
    w2, b2 = linear(ks[2], ks[3], 5, 5)
    w3, b3 = linear(ks[4], ks[5], 5, 1)
    return {"w1": w1, "b1": b1, "w2": w2, "b2": b2, "w3": w3, "b3": b3}


def mynet_forward_ref(x, p):
    h1 = jnp.maximum(x @ p["w1"] + p["b1"], 0.0)
    h2 = jnp.maximum(h1 @ p["w2"] + p["b2"], 0.0)
    return h2 @ p["w3"] + p["b3"]


if __name__ == "__main__":
    key = jax.random.PRNGKey(0)
    k_params, k_x = jax.random.split(key)

    params = init_params(k_params)

    # Producer supplies feature-major data directly (no separate transpose pass
    # before the kernel), per perf review.
    B = 8
    x_fm = jax.random.normal(k_x, (8, B), jnp.float32)  # (features=8, batch=8)

    out = mynet_forward(x_fm, params)
    out = jax.block_until_ready(out)

    ref = mynet_forward_ref(x_fm.T, params)
    assert out.shape == (B, 1), out.shape
    assert jnp.allclose(out, ref, atol=1e-5, rtol=1e-5), "mismatch vs JAX reference"

    print("KERNEL_OK")
</pallas_src>

<mosaic_0001>
module attributes {stable_mosaic.version = 11 : i64} {
  func.func @mlp_kernel(%arg0: i32, %arg1: memref<81xf32, #tpu.memory_space<smem>>, %arg2: memref<8x8x128xf32, #tpu.memory_space<vmem>>, %arg3: memref<8x128xf32, #tpu.memory_space<vmem>>) attributes {dimension_semantics = [#tpu.dimension_semantics<parallel>], iteration_bounds = array<i64: 1>, scalar_prefetch = 0 : i64, scratch_operands = 0 : i64, tpu.core_type = #tpu.core_type<tc>, window_params = [{transform_indices = @transform_0, window_bounds = array<i64: 81>}, {transform_indices = @transform_1, window_bounds = array<i64: 8, 8, 128>}, {transform_indices = @transform_2, window_bounds = array<i64: 8, 128>}]} {
    %c0 = arith.constant 0 : index
    %0 = memref.load %arg1[%c0] : memref<81xf32, #tpu.memory_space<smem>>
    %c1 = arith.constant 1 : index
    %1 = memref.load %arg1[%c1] : memref<81xf32, #tpu.memory_space<smem>>
    %c2 = arith.constant 2 : index
    %2 = memref.load %arg1[%c2] : memref<81xf32, #tpu.memory_space<smem>>
    %c3 = arith.constant 3 : index
    %3 = memref.load %arg1[%c3] : memref<81xf32, #tpu.memory_space<smem>>
    %c4 = arith.constant 4 : index
    %4 = memref.load %arg1[%c4] : memref<81xf32, #tpu.memory_space<smem>>
    %c5 = arith.constant 5 : index
    %5 = memref.load %arg1[%c5] : memref<81xf32, #tpu.memory_space<smem>>
    %c6 = arith.constant 6 : index
    %6 = memref.load %arg1[%c6] : memref<81xf32, #tpu.memory_space<smem>>
    %c7 = arith.constant 7 : index
    %7 = memref.load %arg1[%c7] : memref<81xf32, #tpu.memory_space<smem>>
    %c8 = arith.constant 8 : index
    %8 = memref.load %arg1[%c8] : memref<81xf32, #tpu.memory_space<smem>>
    %c9 = arith.constant 9 : index
    %9 = memref.load %arg1[%c9] : memref<81xf32, #tpu.memory_space<smem>>
    %c10 = arith.constant 10 : index
    %10 = memref.load %arg1[%c10] : memref<81xf32, #tpu.memory_space<smem>>
    %c11 = arith.constant 11 : index
    %11 = memref.load %arg1[%c11] : memref<81xf32, #tpu.memory_space<smem>>
    %c12 = arith.constant 12 : index
    %12 = memref.load %arg1[%c12] : memref<81xf32, #tpu.memory_space<smem>>
    %c13 = arith.constant 13 : index
    %13 = memref.load %arg1[%c13] : memref<81xf32, #tpu.memory_space<smem>>
    %c14 = arith.constant 14 : index
    %14 = memref.load %arg1[%c14] : memref<81xf32, #tpu.memory_space<smem>>
    %c15 = arith.constant 15 : index
    %15 = memref.load %arg1[%c15] : memref<81xf32, #tpu.memory_space<smem>>
    %c16 = arith.constant 16 : index
    %16 = memref.load %arg1[%c16] : memref<81xf32, #tpu.memory_space<smem>>
    %c17 = arith.constant 17 : index
    %17 = memref.load %arg1[%c17] : memref<81xf32, #tpu.memory_space<smem>>
    %c18 = arith.constant 18 : index
    %18 = memref.load %arg1[%c18] : memref<81xf32, #tpu.memory_space<smem>>
    %c19 = arith.constant 19 : index
    %19 = memref.load %arg1[%c19] : memref<81xf32, #tpu.memory_space<smem>>
    %c20 = arith.constant 20 : index
    %20 = memref.load %arg1[%c20] : memref<81xf32, #tpu.memory_space<smem>>
    %c21 = arith.constant 21 : index
    %21 = memref.load %arg1[%c21] : memref<81xf32, #tpu.memory_space<smem>>
    %c22 = arith.constant 22 : index
    %22 = memref.load %arg1[%c22] : memref<81xf32, #tpu.memory_space<smem>>
    %c23 = arith.constant 23 : index
    %23 = memref.load %arg1[%c23] : memref<81xf32, #tpu.memory_space<smem>>
    %c24 = arith.constant 24 : index
    %24 = memref.load %arg1[%c24] : memref<81xf32, #tpu.memory_space<smem>>
    %c25 = arith.constant 25 : index
    %25 = memref.load %arg1[%c25] : memref<81xf32, #tpu.memory_space<smem>>
    %c26 = arith.constant 26 : index
    %26 = memref.load %arg1[%c26] : memref<81xf32, #tpu.memory_space<smem>>
    %c27 = arith.constant 27 : index
    %27 = memref.load %arg1[%c27] : memref<81xf32, #tpu.memory_space<smem>>
    %c28 = arith.constant 28 : index
    %28 = memref.load %arg1[%c28] : memref<81xf32, #tpu.memory_space<smem>>
    %c29 = arith.constant 29 : index
    %29 = memref.load %arg1[%c29] : memref<81xf32, #tpu.memory_space<smem>>
    %c30 = arith.constant 30 : index
    %30 = memref.load %arg1[%c30] : memref<81xf32, #tpu.memory_space<smem>>
    %c31 = arith.constant 31 : index
    %31 = memref.load %arg1[%c31] : memref<81xf32, #tpu.memory_space<smem>>
    %c32 = arith.constant 32 : index
    %32 = memref.load %arg1[%c32] : memref<81xf32, #tpu.memory_space<smem>>
    %c33 = arith.constant 33 : index
    %33 = memref.load %arg1[%c33] : memref<81xf32, #tpu.memory_space<smem>>
    %c34 = arith.constant 34 : index
    %34 = memref.load %arg1[%c34] : memref<81xf32, #tpu.memory_space<smem>>
    %c35 = arith.constant 35 : index
    %35 = memref.load %arg1[%c35] : memref<81xf32, #tpu.memory_space<smem>>
    %c36 = arith.constant 36 : index
    %36 = memref.load %arg1[%c36] : memref<81xf32, #tpu.memory_space<smem>>
    %c37 = arith.constant 37 : index
    %37 = memref.load %arg1[%c37] : memref<81xf32, #tpu.memory_space<smem>>
    %c38 = arith.constant 38 : index
    %38 = memref.load %arg1[%c38] : memref<81xf32, #tpu.memory_space<smem>>
    %c39 = arith.constant 39 : index
    %39 = memref.load %arg1[%c39] : memref<81xf32, #tpu.memory_space<smem>>
    %c40 = arith.constant 40 : index
    %40 = memref.load %arg1[%c40] : memref<81xf32, #tpu.memory_space<smem>>
    %c41 = arith.constant 41 : index
    %41 = memref.load %arg1[%c41] : memref<81xf32, #tpu.memory_space<smem>>
    %c42 = arith.constant 42 : index
    %42 = memref.load %arg1[%c42] : memref<81xf32, #tpu.memory_space<smem>>
    %c43 = arith.constant 43 : index
    %43 = memref.load %arg1[%c43] : memref<81xf32, #tpu.memory_space<smem>>
    %c44 = arith.constant 44 : index
    %44 = memref.load %arg1[%c44] : memref<81xf32, #tpu.memory_space<smem>>
    %c45 = arith.constant 45 : index
    %45 = memref.load %arg1[%c45] : memref<81xf32, #tpu.memory_space<smem>>
    %c46 = arith.constant 46 : index
    %46 = memref.load %arg1[%c46] : memref<81xf32, #tpu.memory_space<smem>>
    %c47 = arith.constant 47 : index
    %47 = memref.load %arg1[%c47] : memref<81xf32, #tpu.memory_space<smem>>
    %c48 = arith.constant 48 : index
    %48 = memref.load %arg1[%c48] : memref<81xf32, #tpu.memory_space<smem>>
    %c49 = arith.constant 49 : index
    %49 = memref.load %arg1[%c49] : memref<81xf32, #tpu.memory_space<smem>>
    %c50 = arith.constant 50 : index
    %50 = memref.load %arg1[%c50] : memref<81xf32, #tpu.memory_space<smem>>
    %c51 = arith.constant 51 : index
    %51 = memref.load %arg1[%c51] : memref<81xf32, #tpu.memory_space<smem>>
    %c52 = arith.constant 52 : index
    %52 = memref.load %arg1[%c52] : memref<81xf32, #tpu.memory_space<smem>>
    %c53 = arith.constant 53 : index
    %53 = memref.load %arg1[%c53] : memref<81xf32, #tpu.memory_space<smem>>
    %c54 = arith.constant 54 : index
    %54 = memref.load %arg1[%c54] : memref<81xf32, #tpu.memory_space<smem>>
    %c55 = arith.constant 55 : index
    %55 = memref.load %arg1[%c55] : memref<81xf32, #tpu.memory_space<smem>>
    %c56 = arith.constant 56 : index
    %56 = memref.load %arg1[%c56] : memref<81xf32, #tpu.memory_space<smem>>
    %c57 = arith.constant 57 : index
    %57 = memref.load %arg1[%c57] : memref<81xf32, #tpu.memory_space<smem>>
    %c58 = arith.constant 58 : index
    %58 = memref.load %arg1[%c58] : memref<81xf32, #tpu.memory_space<smem>>
    %c59 = arith.constant 59 : index
    %59 = memref.load %arg1[%c59] : memref<81xf32, #tpu.memory_space<smem>>
    %c60 = arith.constant 60 : index
    %60 = memref.load %arg1[%c60] : memref<81xf32, #tpu.memory_space<smem>>
    %c61 = arith.constant 61 : index
    %61 = memref.load %arg1[%c61] : memref<81xf32, #tpu.memory_space<smem>>
    %c62 = arith.constant 62 : index
    %62 = memref.load %arg1[%c62] : memref<81xf32, #tpu.memory_space<smem>>
    %c63 = arith.constant 63 : index
    %63 = memref.load %arg1[%c63] : memref<81xf32, #tpu.memory_space<smem>>
    %c64 = arith.constant 64 : index
    %64 = memref.load %arg1[%c64] : memref<81xf32, #tpu.memory_space<smem>>
    %c65 = arith.constant 65 : index
    %65 = memref.load %arg1[%c65] : memref<81xf32, #tpu.memory_space<smem>>
    %c66 = arith.constant 66 : index
    %66 = memref.load %arg1[%c66] : memref<81xf32, #tpu.memory_space<smem>>
    %c67 = arith.constant 67 : index
    %67 = memref.load %arg1[%c67] : memref<81xf32, #tpu.memory_space<smem>>
    %c68 = arith.constant 68 : index
    %68 = memref.load %arg1[%c68] : memref<81xf32, #tpu.memory_space<smem>>
    %c69 = arith.constant 69 : index
    %69 = memref.load %arg1[%c69] : memref<81xf32, #tpu.memory_space<smem>>
    %c70 = arith.constant 70 : index
    %70 = memref.load %arg1[%c70] : memref<81xf32, #tpu.memory_space<smem>>
    %c71 = arith.constant 71 : index
    %71 = memref.load %arg1[%c71] : memref<81xf32, #tpu.memory_space<smem>>
    %c72 = arith.constant 72 : index
    %72 = memref.load %arg1[%c72] : memref<81xf32, #tpu.memory_space<smem>>
    %c73 = arith.constant 73 : index
    %73 = memref.load %arg1[%c73] : memref<81xf32, #tpu.memory_space<smem>>
    %c74 = arith.constant 74 : index
    %74 = memref.load %arg1[%c74] : memref<81xf32, #tpu.memory_space<smem>>
    %c75 = arith.constant 75 : index
    %75 = memref.load %arg1[%c75] : memref<81xf32, #tpu.memory_space<smem>>
    %c76 = arith.constant 76 : index
    %76 = memref.load %arg1[%c76] : memref<81xf32, #tpu.memory_space<smem>>
    %c77 = arith.constant 77 : index
    %77 = memref.load %arg1[%c77] : memref<81xf32, #tpu.memory_space<smem>>
    %c78 = arith.constant 78 : index
    %78 = memref.load %arg1[%c78] : memref<81xf32, #tpu.memory_space<smem>>
    %c79 = arith.constant 79 : index
    %79 = memref.load %arg1[%c79] : memref<81xf32, #tpu.memory_space<smem>>
    %c80 = arith.constant 80 : index
    %80 = memref.load %arg1[%c80] : memref<81xf32, #tpu.memory_space<smem>>
    %c0_i32 = arith.constant 0 : i32
    %c8_i32 = arith.constant 8 : i32
    %81 = arith.muli %c0_i32, %c8_i32 : i32
    %82 = tpu.assume_multiple %81, 8 : i32
    %c0_0 = arith.constant 0 : index
    %83 = arith.index_cast %82 : i32 to index
    %c0_1 = arith.constant 0 : index
    %84 = vector.load %arg2[%c0_0, %83, %c0_1] : memref<8x8x128xf32, #tpu.memory_space<vmem>>, vector<1x8x128xf32>
    %85 = vector.shape_cast %84 : vector<1x8x128xf32> to vector<8x128xf32>
    %86 = vector.broadcast %0 : f32 to vector<8x128xf32>
    %87 = arith.mulf %85, %86 : vector<8x128xf32>
    %88 = vector.broadcast %40 : f32 to vector<8x128xf32>
    %89 = arith.addf %87, %88 : vector<8x128xf32>
    %90 = vector.broadcast %1 : f32 to vector<8x128xf32>
    %91 = arith.mulf %85, %90 : vector<8x128xf32>
    %92 = vector.broadcast %41 : f32 to vector<8x128xf32>
    %93 = arith.addf %91, %92 : vector<8x128xf32>
    %94 = vector.broadcast %2 : f32 to vector<8x128xf32>
    %95 = arith.mulf %85, %94 : vector<8x128xf32>
    %96 = vector.broadcast %42 : f32 to vector<8x128xf32>
    %97 = arith.addf %95, %96 : vector<8x128xf32>
    %98 = vector.broadcast %3 : f32 to vector<8x128xf32>
    %99 = arith.mulf %85, %98 : vector<8x128xf32>
    %100 = vector.broadcast %43 : f32 to vector<8x128xf32>
    %101 = arith.addf %99, %100 : vector<8x128xf32>
    %102 = vector.broadcast %4 : f32 to vector<8x128xf32>
    %103 = arith.mulf %85, %102 : vector<8x128xf32>
    %104 = vector.broadcast %44 : f32 to vector<8x128xf32>
    %105 = arith.addf %103, %104 : vector<8x128xf32>
    %c1_2 = arith.constant 1 : index
    %106 = arith.index_cast %82 : i32 to index
    %c0_3 = arith.constant 0 : index
    %107 = vector.load %arg2[%c1_2, %106, %c0_3] : memref<8x8x128xf32, #tpu.memory_space<vmem>>, vector<1x8x128xf32>
    %108 = vector.shape_cast %107 : vector<1x8x128xf32> to vector<8x128xf32>
    %109 = vector.broadcast %5 : f32 to vector<8x128xf32>
    %110 = arith.mulf %108, %109 : vector<8x128xf32>
    %111 = arith.addf %89, %110 : vector<8x128xf32>
    %112 = vector.broadcast %6 : f32 to vector<8x128xf32>
    %113 = arith.mulf %108, %112 : vector<8x128xf32>
    %114 = arith.addf %93, %113 : vector<8x128xf32>
    %115 = vector.broadcast %7 : f32 to vector<8x128xf32>
    %116 = arith.mulf %108, %115 : vector<8x128xf32>
    %117 = arith.addf %97, %116 : vector<8x128xf32>
    %118 = vector.broadcast %8 : f32 to vector<8x128xf32>
    %119 = arith.mulf %108, %118 : vector<8x128xf32>
    %120 = arith.addf %101, %119 : vector<8x128xf32>
    %121 = vector.broadcast %9 : f32 to vector<8x128xf32>
    %122 = arith.mulf %108, %121 : vector<8x128xf32>
    %123 = arith.addf %105, %122 : vector<8x128xf32>
    %c2_4 = arith.constant 2 : index
    %124 = arith.index_cast %82 : i32 to index
    %c0_5 = arith.constant 0 : index
    %125 = vector.load %arg2[%c2_4, %124, %c0_5] : memref<8x8x128xf32, #tpu.memory_space<vmem>>, vector<1x8x128xf32>
    %126 = vector.shape_cast %125 : vector<1x8x128xf32> to vector<8x128xf32>
    %127 = vector.broadcast %10 : f32 to vector<8x128xf32>
    %128 = arith.mulf %126, %127 : vector<8x128xf32>
    %129 = arith.addf %111, %128 : vector<8x128xf32>
    %130 = vector.broadcast %11 : f32 to vector<8x128xf32>
    %131 = arith.mulf %126, %130 : vector<8x128xf32>
    %132 = arith.addf %114, %131 : vector<8x128xf32>
    %133 = vector.broadcast %12 : f32 to vector<8x128xf32>
    %134 = arith.mulf %126, %133 : vector<8x128xf32>
    %135 = arith.addf %117, %134 : vector<8x128xf32>
    %136 = vector.broadcast %13 : f32 to vector<8x128xf32>
    %137 = arith.mulf %126, %136 : vector<8x128xf32>
    %138 = arith.addf %120, %137 : vector<8x128xf32>
    %139 = vector.broadcast %14 : f32 to vector<8x128xf32>
    %140 = arith.mulf %126, %139 : vector<8x128xf32>
    %141 = arith.addf %123, %140 : vector<8x128xf32>
    %c3_6 = arith.constant 3 : index
    %142 = arith.index_cast %82 : i32 to index
    %c0_7 = arith.constant 0 : index
    %143 = vector.load %arg2[%c3_6, %142, %c0_7] : memref<8x8x128xf32, #tpu.memory_space<vmem>>, vector<1x8x128xf32>
    %144 = vector.shape_cast %143 : vector<1x8x128xf32> to vector<8x128xf32>
    %145 = vector.broadcast %15 : f32 to vector<8x128xf32>
    %146 = arith.mulf %144, %145 : vector<8x128xf32>
    %147 = arith.addf %129, %146 : vector<8x128xf32>
    %148 = vector.broadcast %16 : f32 to vector<8x128xf32>
    %149 = arith.mulf %144, %148 : vector<8x128xf32>
    %150 = arith.addf %132, %149 : vector<8x128xf32>
    %151 = vector.broadcast %17 : f32 to vector<8x128xf32>
    %152 = arith.mulf %144, %151 : vector<8x128xf32>
    %153 = arith.addf %135, %152 : vector<8x128xf32>
    %154 = vector.broadcast %18 : f32 to vector<8x128xf32>
    %155 = arith.mulf %144, %154 : vector<8x128xf32>
    %156 = arith.addf %138, %155 : vector<8x128xf32>
    %157 = vector.broadcast %19 : f32 to vector<8x128xf32>
    %158 = arith.mulf %144, %157 : vector<8x128xf32>
    %159 = arith.addf %141, %158 : vector<8x128xf32>
    %c4_8 = arith.constant 4 : index
    %160 = arith.index_cast %82 : i32 to index
    %c0_9 = arith.constant 0 : index
    %161 = vector.load %arg2[%c4_8, %160, %c0_9] : memref<8x8x128xf32, #tpu.memory_space<vmem>>, vector<1x8x128xf32>
    %162 = vector.shape_cast %161 : vector<1x8x128xf32> to vector<8x128xf32>
    %163 = vector.broadcast %20 : f32 to vector<8x128xf32>
    %164 = arith.mulf %162, %163 : vector<8x128xf32>
    %165 = arith.addf %147, %164 : vector<8x128xf32>
    %166 = vector.broadcast %21 : f32 to vector<8x128xf32>
    %167 = arith.mulf %162, %166 : vector<8x128xf32>
    %168 = arith.addf %150, %167 : vector<8x128xf32>
    %169 = vector.broadcast %22 : f32 to vector<8x128xf32>
    %170 = arith.mulf %162, %169 : vector<8x128xf32>
    %171 = arith.addf %153, %170 : vector<8x128xf32>
    %172 = vector.broadcast %23 : f32 to vector<8x128xf32>
    %173 = arith.mulf %162, %172 : vector<8x128xf32>
    %174 = arith.addf %156, %173 : vector<8x128xf32>
    %175 = vector.broadcast %24 : f32 to vector<8x128xf32>
    %176 = arith.mulf %162, %175 : vector<8x128xf32>
    %177 = arith.addf %159, %176 : vector<8x128xf32>
    %c5_10 = arith.constant 5 : index
    %178 = arith.index_cast %82 : i32 to index
    %c0_11 = arith.constant 0 : index
    %179 = vector.load %arg2[%c5_10, %178, %c0_11] : memref<8x8x128xf32, #tpu.memory_space<vmem>>, vector<1x8x128xf32>
    %180 = vector.shape_cast %179 : vector<1x8x128xf32> to vector<8x128xf32>
    %181 = vector.broadcast %25 : f32 to vector<8x128xf32>
    %182 = arith.mulf %180, %181 : vector<8x128xf32>
    %183 = arith.addf %165, %182 : vector<8x128xf32>
    %184 = vector.broadcast %26 : f32 to vector<8x128xf32>
    %185 = arith.mulf %180, %184 : vector<8x128xf32>
    %186 = arith.addf %168, %185 : vector<8x128xf32>
    %187 = vector.broadcast %27 : f32 to vector<8x128xf32>
    %188 = arith.mulf %180, %187 : vector<8x128xf32>
    %189 = arith.addf %171, %188 : vector<8x128xf32>
    %190 = vector.broadcast %28 : f32 to vector<8x128xf32>
    %191 = arith.mulf %180, %190 : vector<8x128xf32>
    %192 = arith.addf %174, %191 : vector<8x128xf32>
    %193 = vector.broadcast %29 : f32 to vector<8x128xf32>
    %194 = arith.mulf %180, %193 : vector<8x128xf32>
    %195 = arith.addf %177, %194 : vector<8x128xf32>
    %c6_12 = arith.constant 6 : index
    %196 = arith.index_cast %82 : i32 to index
    %c0_13 = arith.constant 0 : index
    %197 = vector.load %arg2[%c6_12, %196, %c0_13] : memref<8x8x128xf32, #tpu.memory_space<vmem>>, vector<1x8x128xf32>
    %198 = vector.shape_cast %197 : vector<1x8x128xf32> to vector<8x128xf32>
    %199 = vector.broadcast %30 : f32 to vector<8x128xf32>
    %200 = arith.mulf %198, %199 : vector<8x128xf32>
    %201 = arith.addf %183, %200 : vector<8x128xf32>
    %202 = vector.broadcast %31 : f32 to vector<8x128xf32>
    %203 = arith.mulf %198, %202 : vector<8x128xf32>
    %204 = arith.addf %186, %203 : vector<8x128xf32>
    %205 = vector.broadcast %32 : f32 to vector<8x128xf32>
    %206 = arith.mulf %198, %205 : vector<8x128xf32>
    %207 = arith.addf %189, %206 : vector<8x128xf32>
    %208 = vector.broadcast %33 : f32 to vector<8x128xf32>
    %209 = arith.mulf %198, %208 : vector<8x128xf32>
    %210 = arith.addf %192, %209 : vector<8x128xf32>
    %211 = vector.broadcast %34 : f32 to vector<8x128xf32>
    %212 = arith.mulf %198, %211 : vector<8x128xf32>
    %213 = arith.addf %195, %212 : vector<8x128xf32>
    %c7_14 = arith.constant 7 : index
    %214 = arith.index_cast %82 : i32 to index
    %c0_15 = arith.constant 0 : index
    %215 = vector.load %arg2[%c7_14, %214, %c0_15] : memref<8x8x128xf32, #tpu.memory_space<vmem>>, vector<1x8x128xf32>
    %216 = vector.shape_cast %215 : vector<1x8x128xf32> to vector<8x128xf32>
    %217 = vector.broadcast %35 : f32 to vector<8x128xf32>
    %218 = arith.mulf %216, %217 : vector<8x128xf32>
    %219 = arith.addf %201, %218 : vector<8x128xf32>
    %220 = vector.broadcast %36 : f32 to vector<8x128xf32>
    %221 = arith.mulf %216, %220 : vector<8x128xf32>
    %222 = arith.addf %204, %221 : vector<8x128xf32>
    %223 = vector.broadcast %37 : f32 to vector<8x128xf32>
    %224 = arith.mulf %216, %223 : vector<8x128xf32>
    %225 = arith.addf %207, %224 : vector<8x128xf32>
    %226 = vector.broadcast %38 : f32 to vector<8x128xf32>
    %227 = arith.mulf %216, %226 : vector<8x128xf32>
    %228 = arith.addf %210, %227 : vector<8x128xf32>
    %229 = vector.broadcast %39 : f32 to vector<8x128xf32>
    %230 = arith.mulf %216, %229 : vector<8x128xf32>
    %231 = arith.addf %213, %230 : vector<8x128xf32>
    %cst = arith.constant 0.000000e+00 : f32
    %232 = vector.broadcast %cst : f32 to vector<8x128xf32>
    %233 = arith.maximumf %219, %232 : vector<8x128xf32>
    %cst_16 = arith.constant 0.000000e+00 : f32
    %234 = vector.broadcast %cst_16 : f32 to vector<8x128xf32>
    %235 = arith.maximumf %222, %234 : vector<8x128xf32>
    %cst_17 = arith.constant 0.000000e+00 : f32
    %236 = vector.broadcast %cst_17 : f32 to vector<8x128xf32>
    %237 = arith.maximumf %225, %236 : vector<8x128xf32>
    %cst_18 = arith.constant 0.000000e+00 : f32
    %238 = vector.broadcast %cst_18 : f32 to vector<8x128xf32>
    %239 = arith.maximumf %228, %238 : vector<8x128xf32>
    %cst_19 = arith.constant 0.000000e+00 : f32
    %240 = vector.broadcast %cst_19 : f32 to vector<8x128xf32>
    %241 = arith.maximumf %231, %240 : vector<8x128xf32>
    %242 = vector.broadcast %45 : f32 to vector<8x128xf32>
    %243 = arith.mulf %233, %242 : vector<8x128xf32>
    %244 = vector.broadcast %70 : f32 to vector<8x128xf32>
    %245 = arith.addf %243, %244 : vector<8x128xf32>
    %246 = vector.broadcast %46 : f32 to vector<8x128xf32>
    %247 = arith.mulf %233, %246 : vector<8x128xf32>
    %248 = vector.broadcast %71 : f32 to vector<8x128xf32>
    %249 = arith.addf %247, %248 : vector<8x128xf32>
    %250 = vector.broadcast %47 : f32 to vector<8x128xf32>
    %251 = arith.mulf %233, %250 : vector<8x128xf32>
    %252 = vector.broadcast %72 : f32 to vector<8x128xf32>
    %253 = arith.addf %251, %252 : vector<8x128xf32>
    %254 = vector.broadcast %48 : f32 to vector<8x128xf32>
    %255 = arith.mulf %233, %254 : vector<8x128xf32>
    %256 = vector.broadcast %73 : f32 to vector<8x128xf32>
    %257 = arith.addf %255, %256 : vector<8x128xf32>
    %258 = vector.broadcast %49 : f32 to vector<8x128xf32>
    %259 = arith.mulf %233, %258 : vector<8x128xf32>
    %260 = vector.broadcast %74 : f32 to vector<8x128xf32>
    %261 = arith.addf %259, %260 : vector<8x128xf32>
    %262 = vector.broadcast %50 : f32 to vector<8x128xf32>
    %263 = arith.mulf %235, %262 : vector<8x128xf32>
    %264 = arith.addf %245, %263 : vector<8x128xf32>
    %265 = vector.broadcast %51 : f32 to vector<8x128xf32>
    %266 = arith.mulf %235, %265 : vector<8x128xf32>
    %267 = arith.addf %249, %266 : vector<8x128xf32>
    %268 = vector.broadcast %52 : f32 to vector<8x128xf32>
    %269 = arith.mulf %235, %268 : vector<8x128xf32>
    %270 = arith.addf %253, %269 : vector<8x128xf32>
    %271 = vector.broadcast %53 : f32 to vector<8x128xf32>
    %272 = arith.mulf %235, %271 : vector<8x128xf32>
    %273 = arith.addf %257, %272 : vector<8x128xf32>
    %274 = vector.broadcast %54 : f32 to vector<8x128xf32>
    %275 = arith.mulf %235, %274 : vector<8x128xf32>
    %276 = arith.addf %261, %275 : vector<8x128xf32>
    %277 = vector.broadcast %55 : f32 to vector<8x128xf32>
    %278 = arith.mulf %237, %277 : vector<8x128xf32>
    %279 = arith.addf %264, %278 : vector<8x128xf32>
    %280 = vector.broadcast %56 : f32 to vector<8x128xf32>
    %281 = arith.mulf %237, %280 : vector<8x128xf32>
    %282 = arith.addf %267, %281 : vector<8x128xf32>
    %283 = vector.broadcast %57 : f32 to vector<8x128xf32>
    %284 = arith.mulf %237, %283 : vector<8x128xf32>
    %285 = arith.addf %270, %284 : vector<8x128xf32>
    %286 = vector.broadcast %58 : f32 to vector<8x128xf32>
    %287 = arith.mulf %237, %286 : vector<8x128xf32>
    %288 = arith.addf %273, %287 : vector<8x128xf32>
    %289 = vector.broadcast %59 : f32 to vector<8x128xf32>
    %290 = arith.mulf %237, %289 : vector<8x128xf32>
    %291 = arith.addf %276, %290 : vector<8x128xf32>
    %292 = vector.broadcast %60 : f32 to vector<8x128xf32>
    %293 = arith.mulf %239, %292 : vector<8x128xf32>
    %294 = arith.addf %279, %293 : vector<8x128xf32>
    %295 = vector.broadcast %61 : f32 to vector<8x128xf32>
    %296 = arith.mulf %239, %295 : vector<8x128xf32>
    %297 = arith.addf %282, %296 : vector<8x128xf32>
    %298 = vector.broadcast %62 : f32 to vector<8x128xf32>
    %299 = arith.mulf %239, %298 : vector<8x128xf32>
    %300 = arith.addf %285, %299 : vector<8x128xf32>
    %301 = vector.broadcast %63 : f32 to vector<8x128xf32>
    %302 = arith.mulf %239, %301 : vector<8x128xf32>
    %303 = arith.addf %288, %302 : vector<8x128xf32>
    %304 = vector.broadcast %64 : f32 to vector<8x128xf32>
    %305 = arith.mulf %239, %304 : vector<8x128xf32>
    %306 = arith.addf %291, %305 : vector<8x128xf32>
    %307 = vector.broadcast %65 : f32 to vector<8x128xf32>
    %308 = arith.mulf %241, %307 : vector<8x128xf32>
    %309 = arith.addf %294, %308 : vector<8x128xf32>
    %310 = vector.broadcast %66 : f32 to vector<8x128xf32>
    %311 = arith.mulf %241, %310 : vector<8x128xf32>
    %312 = arith.addf %297, %311 : vector<8x128xf32>
    %313 = vector.broadcast %67 : f32 to vector<8x128xf32>
    %314 = arith.mulf %241, %313 : vector<8x128xf32>
    %315 = arith.addf %300, %314 : vector<8x128xf32>
    %316 = vector.broadcast %68 : f32 to vector<8x128xf32>
    %317 = arith.mulf %241, %316 : vector<8x128xf32>
    %318 = arith.addf %303, %317 : vector<8x128xf32>
    %319 = vector.broadcast %69 : f32 to vector<8x128xf32>
    %320 = arith.mulf %241, %319 : vector<8x128xf32>
    %321 = arith.addf %306, %320 : vector<8x128xf32>
    %cst_20 = arith.constant 0.000000e+00 : f32
    %322 = vector.broadcast %cst_20 : f32 to vector<8x128xf32>
    %323 = arith.maximumf %309, %322 : vector<8x128xf32>
    %cst_21 = arith.constant 0.000000e+00 : f32
    %324 = vector.broadcast %cst_21 : f32 to vector<8x128xf32>
    %325 = arith.maximumf %312, %324 : vector<8x128xf32>
    %cst_22 = arith.constant 0.000000e+00 : f32
    %326 = vector.broadcast %cst_22 : f32 to vector<8x128xf32>
    %327 = arith.maximumf %315, %326 : vector<8x128xf32>
    %cst_23 = arith.constant 0.000000e+00 : f32
    %328 = vector.broadcast %cst_23 : f32 to vector<8x128xf32>
    %329 = arith.maximumf %318, %328 : vector<8x128xf32>
    %cst_24 = arith.constant 0.000000e+00 : f32
    %330 = vector.broadcast %cst_24 : f32 to vector<8x128xf32>
    %331 = arith.maximumf %321, %330 : vector<8x128xf32>
    %332 = vector.broadcast %75 : f32 to vector<8x128xf32>
    %333 = arith.mulf %323, %332 : vector<8x128xf32>
    %334 = vector.broadcast %80 : f32 to vector<8x128xf32>
    %335 = arith.addf %333, %334 : vector<8x128xf32>
    %336 = vector.broadcast %76 : f32 to vector<8x128xf32>
    %337 = arith.mulf %325, %336 : vector<8x128xf32>
    %338 = arith.addf %335, %337 : vector<8x128xf32>
    %339 = vector.broadcast %77 : f32 to vector<8x128xf32>
    %340 = arith.mulf %327, %339 : vector<8x128xf32>
    %341 = arith.addf %338, %340 : vector<8x128xf32>
    %342 = vector.broadcast %78 : f32 to vector<8x128xf32>
    %343 = arith.mulf %329, %342 : vector<8x128xf32>
    %344 = arith.addf %341, %343 : vector<8x128xf32>
    %345 = vector.broadcast %79 : f32 to vector<8x128xf32>
    %346 = arith.mulf %331, %345 : vector<8x128xf32>
    %347 = arith.addf %344, %346 : vector<8x128xf32>
    %348 = arith.index_cast %82 : i32 to index
    %c0_25 = arith.constant 0 : index
    %349 = vector.load %arg3[%348, %c0_25] : memref<8x128xf32, #tpu.memory_space<vmem>>, vector<8x128xf32>
    tpu.vector_store %arg3[%348, %c0_25], %347 {strides = array<i32>} : memref<8x128xf32, #tpu.memory_space<vmem>>, vector<8x128xf32>,
    %c1_i32 = arith.constant 1 : i32
    return
  }
  func.func @transform_0(%arg0: i32) -> i32 {
    %c0_i32 = arith.constant 0 : i32
    %c0_i32_0 = arith.constant 0 : i32
    return %c0_i32 : i32
  }
  func.func @transform_1(%arg0: i32) -> (i32, i32, i32) {
    %c0_i32 = arith.constant 0 : i32
    %c0_i32_0 = arith.constant 0 : i32
    %c0_i32_1 = arith.constant 0 : i32
    return %c0_i32, %arg0, %c0_i32_0 : i32, i32, i32
  }
  func.func @transform_2(%arg0: i32) -> (i32, i32) {
    %c0_i32 = arith.constant 0 : i32
    %c0_i32_0 = arith.constant 0 : i32
    return %arg0, %c0_i32 : i32, i32
  }
}

</mosaic_0001>

<bundles_post_ra>
// kernel: tpu_custom_call.1
= control target key start
LH: loop header
LB: loop body
LE: loop exit
PB: predicated region body
PF: predicated region fallthrough
CT: control target
= control target key end

     0   :  { %7 = vsyncpa [#allocation5], 0  ;;  %s974_s0 = inlined_call_operand.hbm [shape: f32[81], index: 0, kind: input, shape index: {}]   ;;  %s975_s1 = inlined_call_operand.hbm [shape: f32[8,8,128], index: 1, kind: input, shape index: {}]   ;;  %s976_s2 = inlined_call_operand.hbm [shape: f32[8,128], index: 2, kind: output, shape index: {}]  }
   0x1   :  { %8 = vsyncpa [#allocation3], 0 }
   0x2   :  { %9 = vsyncpa [#allocation4], 0  ;;  %s480_s11 = scalar_lea.hbm %s974_s0, 16 }
   0x3   :  { %p481_p0 = scmp.ne.s32.totalorder %s974_s0, %s480_s11  ;;  %p484_p1 = scmp.lt.u32.totalorder %s480_s11, %s974_s0 }
   0x5   :  { %p486_p2 = pnand %p484_p1, %p481_p0 }
   0x7   :  { %489 = shalt.err (!%p486_p2)
}
   0x8   :  { %s540_s16 = smov [#allocation2]   ;;  %s541_s19 = smov [#allocation6]  }
   0x9   :  { %17 = dma.hbm_to_smem %s974_s0, 16, %s540_s16, [#allocation5]  }
   0xa   :  { %s23_s20 = sshll.u32 %s541_s19, 4  ;;  %s490_s23 = scalar_lea.hbm %s975_s1, 1024  ;;  %s24_s20 = int_to_ptr.vmem [resolvable:$true] %s23_s20 }
   0xb   :  { %p491_p3 = scmp.ne.s32.totalorder %s975_s1, %s490_s23  ;;  %p494_p4 = scmp.lt.u32.totalorder %s490_s23, %s975_s1 }
   0xd   :  { %p496_p5 = pnand %p494_p4, %p491_p3 }
   0xf   :  { %499 = shalt.err (!%p496_p5)
}
  0x10   :  { %s500_s28 = scalar_lea.vmem %s24_s20, 1024  ;;  %p505_p7 = scmp.lt.s32.totalorder %s24_s20, %s24_s20 }
  0x11   :  { %p501_p6 = scmp.ne.s32.totalorder %s24_s20, %s500_s28  ;;  %p506_p8 = scmp.lt.s32.totalorder %s500_s28, %s500_s28 }
  0x13   :  { %p507_p9 = por %p506_p8, %p505_p7 }
  0x15   :  { %p508_p10 = pnand %p507_p9, %p501_p6 }
  0x17   :  { %511 = shalt.err (!%p508_p10)
}
  0x18   :  { %s542_s0 = smov 128   ;;  %s543_s29 = smov 8  }
  0x19   :  { %29 = dma.hbm_to_vmem [thread:$0]  %s975_s1, 1024, %s24_s20, [#allocation3], %s542_s0, %s542_s0, %s543_s29  }
  0x1a   :  { %534 = dma.done.wait [#allocation5], 16  }
  0x1b   :  { %535 = vsyncadd [#allocation5], 4294967280 }
  0x1c   :  { %536 = dma.done.wait [#allocation3], 1024  }
  0x1d   :  { %537 = vsyncadd [#allocation3], 4294966272 }
  0x1e   :  { %36 = sfence }
  0x1f   :  { %s37_s4 = sld [smem:[#allocation2]]  ;;  %s395_s5 = sld [smem:[#allocation2 + $0x1]]  ;;  %v118_v0 = vld [vmem:[#allocation6] sm:$0xff]  ;;  %v141_v3 = vld [vmem:[#allocation6 + $0x8] sm:$0xff]  ;;  %v159_v16 = vld [vmem:[#allocation6 + $0x10] sm:$0xff] }
  0x20   :  { %s396_s6 = sld [smem:[#allocation2 + $0x2]]  ;;  %s397_s7 = sld [smem:[#allocation2 + $0x3]]  ;;  %v177_v25 = vld [vmem:[#allocation6 + $0x18] sm:$0xff]  ;;  %v195_v38 = vld [vmem:[#allocation6 + $0x20] sm:$0xff]  ;;  %v213_v47 = vld [vmem:[#allocation6 + $0x28] sm:$0xff] }
  0x21   :  { %s398_s8 = sld [smem:[#allocation2 + $0x4]]  ;;  %s399_s9 = sld [smem:[#allocation2 + $0x5]]  ;;  %v231_v60 = vld [vmem:[#allocation6 + $0x30] sm:$0xff] }
  0x22   :  { %s584_s10 = sld [smem:[#allocation2 + $0x6]]  ;;  %s586_s11 = sld [smem:[#allocation2 + $0x7]] }
  0x23   :  { %s588_s12 = sld [smem:[#allocation2 + $0x8]]  ;;  %s590_s13 = sld [smem:[#allocation2 + $0x9]] }
  0x24   :  { %s592_s1 = sld [smem:[#allocation2 + $0xa]]  ;;  %s594_s14 = sld [smem:[#allocation2 + $0xb]] }
  0x25   :  { %s596_s15 = sld [smem:[#allocation2 + $0xc]]  ;;  %s598_s16 = sld [smem:[#allocation2 + $0xd]]  ;;  %v119_v1 = vstv %s37_s4  ;;  %v123_v2 = vstv %s395_s5 }
  0x26   :  { %s600_s17 = sld [smem:[#allocation2 + $0xe]]  ;;  %s602_s18 = sld [smem:[#allocation2 + $0xf]]  ;;  %v604_v4 = vmul.f32 %v119_v1, %v118_v0  ;;  %v606_v5 = vmul.f32 %v123_v2, %v118_v0  ;;  %v127_v6 = vstv %s396_s6  ;;  %v131_v7 = vstv %s397_s7 }
  0x27   :  { %s608_s19 = sld [smem:[#allocation2 + $0x10]]  ;;  %s610_s20 = sld [smem:[#allocation2 + $0x11]]  ;;  %v612_v8 = vmul.f32 %v127_v6, %v118_v0  ;;  %v614_v9 = vmul.f32 %v131_v7, %v118_v0  ;;  %v135_v10 = vstv %s398_s8  ;;  %v142_v11 = vstv %s399_s9  ;;  %v249_v7 = vld [vmem:[#allocation6 + $0x38] sm:$0xff] }
  0x28   :  { %s616_s21 = sld [smem:[#allocation2 + $0x12]]  ;;  %s618_s22 = sld [smem:[#allocation2 + $0x13]]  ;;  %v620_v12 = vmul.f32 %v135_v10, %v118_v0  ;;  %v622_v13 = vmul.f32 %v142_v11, %v141_v3  ;;  %v145_v14 = vstv %s584_s10  ;;  %v148_v15 = vstv %s586_s11 }
  0x29   :  { %s626_s23 = sld [smem:[#allocation2 + $0x14]]  ;;  %s628_s24 = sld [smem:[#allocation2 + $0x15]]  ;;  %v630_v17 = vmul.f32 %v145_v14, %v141_v3  ;;  %v632_v18 = vmul.f32 %v148_v15, %v141_v3  ;;  %v151_v19 = vstv %s588_s12  ;;  %v154_v20 = vstv %s590_s13 }
  0x2a   :  { %s636_s25 = sld [smem:[#allocation2 + $0x16]]  ;;  %s638_s26 = sld [smem:[#allocation2 + $0x17]]  ;;  %v640_v21 = vmul.f32 %v151_v19, %v141_v3  ;;  %v642_v22 = vmul.f32 %v154_v20, %v141_v3  ;;  %v160_v23 = vstv %s592_s1  ;;  %v163_v24 = vstv %s594_s14 }
  0x2b   :  { %s646_s27 = sld [smem:[#allocation2 + $0x18]]  ;;  %s648_s28 = sld [smem:[#allocation2 + $0x19]]  ;;  %v650_v26 = vmul.f32 %v160_v23, %v159_v16  ;;  %v652_v27 = vmul.f32 %v163_v24, %v159_v16  ;;  %v166_v28 = vstv %s596_s15  ;;  %v169_v29 = vstv %s598_s16 }
  0x2c   :  { %s656_s0 = sld [smem:[#allocation2 + $0x1a]]  ;;  %s658_s29 = sld [smem:[#allocation2 + $0x1b]]  ;;  %v660_v30 = vmul.f32 %v166_v28, %v159_v16  ;;  %v662_v31 = vmul.f32 %v169_v29, %v159_v16  ;;  %v172_v32 = vstv %s600_s17  ;;  %v178_v33 = vstv %s602_s18 }
  0x2d   :  { %s666_s30 = sld [smem:[#allocation2 + $0x1c]]  ;;  %s668_s3 = sld [smem:[#allocation2 + $0x1d]]  ;;  %v670_v34 = vmul.f32 %v172_v32, %v159_v16  ;;  %v672_v35 = vmul.f32 %v178_v33, %v177_v25  ;;  %v181_v36 = vstv %s608_s19  ;;  %v184_v37 = vstv %s610_s20 }
  0x2e   :  { %s676_s4 = sld [smem:[#allocation2 + $0x1e]]  ;;  %s678_s5 = sld [smem:[#allocation2 + $0x1f]]  ;;  %v680_v39 = vmul.f32 %v181_v36, %v177_v25  ;;  %v682_v40 = vmul.f32 %v184_v37, %v177_v25  ;;  %v187_v41 = vstv %s616_s21  ;;  %v190_v42 = vstv %s618_s22 }
  0x2f   :  { %s686_s6 = sld [smem:[#allocation2 + $0x20]]  ;;  %s688_s7 = sld [smem:[#allocation2 + $0x21]]  ;;  %v690_v43 = vmul.f32 %v187_v41, %v177_v25  ;;  %v692_v44 = vmul.f32 %v190_v42, %v177_v25  ;;  %v196_v45 = vstv %s626_s23  ;;  %v199_v46 = vstv %s628_s24 }
  0x30   :  { %s696_s8 = sld [smem:[#allocation2 + $0x22]]  ;;  %s698_s9 = sld [smem:[#allocation2 + $0x23]]  ;;  %v700_v48 = vmul.f32 %v196_v45, %v195_v38  ;;  %v702_v49 = vmul.f32 %v199_v46, %v195_v38  ;;  %v202_v50 = vstv %s636_s25  ;;  %v205_v51 = vstv %s638_s26 }
  0x31   :  { %s706_s10 = sld [smem:[#allocation2 + $0x24]]  ;;  %s708_s11 = sld [smem:[#allocation2 + $0x25]]  ;;  %v710_v52 = vmul.f32 %v202_v50, %v195_v38  ;;  %v712_v53 = vmul.f32 %v205_v51, %v195_v38  ;;  %v208_v54 = vstv %s646_s27  ;;  %v214_v55 = vstv %s648_s28 }
  0x32   :  { %s716_s12 = sld [smem:[#allocation2 + $0x26]]  ;;  %s718_s13 = sld [smem:[#allocation2 + $0x27]]  ;;  %v720_v56 = vmul.f32 %v208_v54, %v195_v38  ;;  %v722_v57 = vmul.f32 %v214_v55, %v213_v47  ;;  %v217_v58 = vstv %s656_s0  ;;  %v220_v59 = vstv %s658_s29 }
  0x33   :  { %s726_s1 = sld [smem:[#allocation2 + $0x28]]  ;;  %s728_s14 = sld [smem:[#allocation2 + $0x29]]  ;;  %v730_v61 = vmul.f32 %v217_v58, %v213_v47  ;;  %v732_v62 = vmul.f32 %v220_v59, %v213_v47  ;;  %v223_v63 = vstv %s666_s30  ;;  %v226_v0 = vstv %s668_s3 }
  0x34   :  { %s736_s15 = sld [smem:[#allocation2 + $0x2a]]  ;;  %s738_s16 = sld [smem:[#allocation2 + $0x2b]]  ;;  %v740_v1 = vmul.f32 %v223_v63, %v213_v47  ;;  %v742_v2 = vmul.f32 %v226_v0, %v213_v47  ;;  %v232_v3 = vstv %s676_s4  ;;  %v235_v6 = vstv %s678_s5 }
  0x35   :  { %s746_s17 = sld [smem:[#allocation2 + $0x2c]]  ;;  %s748_s18 = sld [smem:[#allocation2 + $0x2d]]  ;;  %v750_v10 = vmul.f32 %v232_v3, %v231_v60  ;;  %v752_v11 = vmul.f32 %v235_v6, %v231_v60  ;;  %v238_v14 = vstv %s686_s6  ;;  %v241_v15 = vstv %s688_s7 }
  0x36   :  { %s756_s19 = sld [smem:[#allocation2 + $0x2e]]  ;;  %s758_s20 = sld [smem:[#allocation2 + $0x2f]]  ;;  %v760_v16 = vmul.f32 %v238_v14, %v231_v60  ;;  %v762_v19 = vmul.f32 %v241_v15, %v231_v60  ;;  %v244_v20 = vstv %s696_s8  ;;  %v250_v23 = vstv %s698_s9 }
  0x37   :  { %s766_s21 = sld [smem:[#allocation2 + $0x30]]  ;;  %s768_s22 = sld [smem:[#allocation2 + $0x31]]  ;;  %v770_v24 = vmul.f32 %v244_v20, %v231_v60  ;;  %v772_v25 = vmul.f32 %v250_v23, %v249_v7  ;;  %v253_v28 = vstv %s706_s10  ;;  %v256_v29 = vstv %s708_s11 }
  0x38   :  { %s776_s23 = sld [smem:[#allocation2 + $0x32]]  ;;  %s778_s24 = sld [smem:[#allocation2 + $0x33]]  ;;  %v780_v32 = vmul.f32 %v253_v28, %v249_v7  ;;  %v782_v33 = vmul.f32 %v256_v29, %v249_v7  ;;  %v259_v36 = vstv %s716_s12  ;;  %v262_v37 = vstv %s718_s13 }
  0x39   :  { %s786_s25 = sld [smem:[#allocation2 + $0x34]]  ;;  %s788_s26 = sld [smem:[#allocation2 + $0x35]]  ;;  %v121_v38 = vstv %s726_s1  ;;  %v125_v41 = vstv %s728_s14  ;;  %v792_v42 = vmul.f32 %v259_v36, %v249_v7  ;;  %v794_v45 = vmul.f32 %v262_v37, %v249_v7 }
  0x3a   :  { %s796_s27 = sld [smem:[#allocation2 + $0x36]]  ;;  %s798_s28 = sld [smem:[#allocation2 + $0x37]]  ;;  %v122_v46 = vadd.f32 %v121_v38, %v604_v4  ;;  %v126_v47 = vadd.f32 %v125_v41, %v606_v5  ;;  %v129_v50 = vstv %s736_s15  ;;  %v133_v51 = vstv %s738_s16 }
  0x3b   :  { %s804_s0 = sld [smem:[#allocation2 + $0x38]]  ;;  %s806_s29 = sld [smem:[#allocation2 + $0x39]]  ;;  %v130_v54 = vadd.f32 %v129_v50, %v612_v8  ;;  %v134_v55 = vadd.f32 %v133_v51, %v614_v9  ;;  %v137_v58 = vstv %s746_s17  ;;  %v270_v59 = vstv %s748_s18 }
  0x3c   :  { %s812_s30 = sld [smem:[#allocation2 + $0x3a]]  ;;  %v138_v4 = vadd.f32 %v137_v58, %v620_v12  ;;  %v144_v5 = vadd.f32 %v622_v13, %v122_v46  ;;  %v147_v60 = vadd.f32 %v630_v17, %v126_v47  ;;  %v274_v63 = vstv %s756_s19  ;;  %s818_s3 = sld [smem:[#allocation2 + $0x3b]] }
  0x3d   :  { %s820_s4 = sld [smem:[#allocation2 + $0x3c]]  ;;  %v150_v8 = vadd.f32 %v632_v18, %v130_v54  ;;  %v153_v9 = vadd.f32 %v640_v21, %v134_v55  ;;  %v278_v0 = vstv %s758_s20  ;;  %v282_v3 = vstv %s766_s21  ;;  %s826_s5 = sld [smem:[#allocation2 + $0x3d]] }
  0x3e   :  { %v156_v12 = vadd.f32 %v642_v22, %v138_v4  ;;  %v162_v13 = vadd.f32 %v650_v26, %v144_v5  ;;  %v165_v17 = vadd.f32 %v652_v27, %v147_v60  ;;  %v286_v6 = vstv %s768_s22  ;;  %s832_s6 = sld [smem:[#allocation2 + $0x3e]]  ;;  %s834_s7 = sld [smem:[#allocation2 + $0x3f]] }
  0x3f   :  { %v168_v18 = vadd.f32 %v660_v30, %v150_v8  ;;  %v171_v21 = vadd.f32 %v662_v31, %v153_v9  ;;  %v290_v7 = vstv %s776_s23  ;;  %v293_v14 = vstv %s778_s24  ;;  %s844_s8 = sld [smem:[#allocation2 + $0x40]]  ;;  %s850_s9 = sld [smem:[#allocation2 + $0x46]] }
  0x40   :  { %v174_v22 = vadd.f32 %v670_v34, %v156_v12  ;;  %v180_v26 = vadd.f32 %v672_v35, %v162_v13  ;;  %v183_v15 = vadd.f32 %v680_v39, %v165_v17  ;;  %v296_v27 = vstv %s786_s25  ;;  %s852_s10 = sld [smem:[#allocation2 + $0x47]]  ;;  %s858_s11 = sld [smem:[#allocation2 + $0x48]] }
  0x41   :  { %v186_v20 = vadd.f32 %v682_v40, %v168_v18  ;;  %v189_v30 = vadd.f32 %v690_v43, %v171_v21  ;;  %v299_v23 = vstv %s788_s26  ;;  %v302_v31 = vstv %s796_s27  ;;  %s860_s12 = sld [smem:[#allocation2 + $0x49]]  ;;  %s866_s13 = sld [smem:[#allocation2 + $0x4a]] }
  0x42   :  { %v192_v34 = vadd.f32 %v692_v44, %v174_v22  ;;  %v198_v35 = vadd.f32 %v700_v48, %v180_v26  ;;  %v201_v39 = vadd.f32 %v702_v49, %v183_v15  ;;  %v305_v28 = vstv %s798_s28  ;;  %s904_s1 = sld [smem:[#allocation2 + $0x41]]  ;;  %s914_s14 = sld [smem:[#allocation2 + $0x42]] }
  0x43   :  { %v204_v40 = vadd.f32 %v710_v52, %v186_v20  ;;  %v207_v43 = vadd.f32 %v712_v53, %v189_v30  ;;  %v308_v29 = vstv %s804_s0  ;;  %v311_v36 = vstv %s806_s29  ;;  %s916_s15 = sld [smem:[#allocation2 + $0x43]]  ;;  %s920_s16 = sld [smem:[#allocation2 + $0x44]] }
  0x44   :  { %v210_v44 = vadd.f32 %v720_v56, %v192_v34  ;;  %v216_v48 = vadd.f32 %v722_v57, %v198_v35  ;;  %v219_v49 = vadd.f32 %v730_v61, %v201_v39  ;;  %v314_v37 = vstv %s812_s30  ;;  %s926_s17 = sld [smem:[#allocation2 + $0x45]]  ;;  %s930_s18 = sld [smem:[#allocation2 + $0x4b]] }
  0x45   :  { %v222_v38 = vadd.f32 %v732_v62, %v204_v40  ;;  %v225_v52 = vadd.f32 %v740_v1, %v207_v43  ;;  %v317_v41 = vstv %s818_s3  ;;  %v320_v53 = vstv %s820_s4  ;;  %s936_s19 = sld [smem:[#allocation2 + $0x4c]]  ;;  %s938_s20 = sld [smem:[#allocation2 + $0x50]] }
  0x46   :  { %v228_v46 = vadd.f32 %v742_v2, %v210_v44  ;;  %v234_v47 = vadd.f32 %v750_v10, %v216_v48  ;;  %v237_v56 = vadd.f32 %v752_v11, %v219_v49  ;;  %v323_v50 = vstv %s826_s5  ;;  %s940_s21 = sld [smem:[#allocation2 + $0x4d]]  ;;  %s942_s22 = sld [smem:[#allocation2 + $0x4e]] }
  0x47   :  { %v240_v57 = vadd.f32 %v760_v16, %v222_v38  ;;  %v243_v61 = vadd.f32 %v762_v19, %v225_v52  ;;  %v326_v51 = vstv %s832_s6  ;;  %v329_v62 = vstv %s834_s7  ;;  %s948_s23 = sld [smem:[#allocation2 + $0x4f]]  ;;  %s544_s24 = smov [#allocation7]  }
  0x48   :  { %v246_v1 = vadd.f32 %v770_v24, %v228_v46  ;;  %v252_v54 = vadd.f32 %v772_v25, %v234_v47  ;;  %v255_v2 = vadd.f32 %v780_v32, %v237_v56  ;;  %v272_v10 = vstv %s850_s9  ;;  %s378_s25 = sshll.u32 %s544_s24, 4  ;;  %s379_s25 = int_to_ptr.vmem [resolvable:$true] %s378_s25 }
  0x49   :  { %v258_v11 = vadd.f32 %v782_v33, %v240_v57  ;;  %v261_v16 = vadd.f32 %v792_v42, %v243_v61  ;;  %v276_v19 = vstv %s852_s10  ;;  %v280_v55 = vstv %s858_s11  ;;  %s512_s26 = scalar_lea.vmem %s379_s25, 128  ;;  %p517_p12 = scmp.lt.s32.totalorder %s379_s25, %s379_s25 }
  0x4a   :  { %v264_v58 = vadd.f32 %v794_v45, %v246_v1  ;;  %v265_v24 = vmax.f32 %v252_v54, 0.0  ;;  %v266_v25 = vmax.f32 %v255_v2, 0.0  ;;  %v284_v4 = vstv %s860_s12  ;;  %p513_p11 = scmp.ne.s32.totalorder %s379_s25, %s512_s26  ;;  %p518_p13 = scmp.lt.s32.totalorder %s512_s26, %s512_s26 }
  0x4b   :  { %v267_v5 = vmax.f32 %v258_v11, 0.0  ;;  %v268_v32 = vmax.f32 %v261_v16, 0.0  ;;  %v288_v60 = vstv %s866_s13  ;;  %v332_v8 = vstv %s844_s8 }
  0x4c   :  { %v896_v9 = vmax.f32 %v264_v58, 0.0  ;;  %v271_v33 = vmul.f32 %v270_v59, %v265_v24  ;;  %v275_v42 = vmul.f32 %v274_v63, %v265_v24  ;;  %v279_v12 = vmul.f32 %v278_v0, %v265_v24  ;;  %p519_p0 = por %p518_p13, %p517_p12 }
  0x4d   :  { %v283_v45 = vmul.f32 %v282_v3, %v265_v24  ;;  %v287_v13 = vmul.f32 %v286_v6, %v265_v24  ;;  %v291_v17 = vmul.f32 %v290_v7, %v266_v25  ;;  %v294_v18 = vmul.f32 %v293_v14, %v266_v25 }
  0x4e   :  { %v273_v59 = vadd.f32 %v272_v10, %v271_v33  ;;  %v277_v63 = vadd.f32 %v276_v19, %v275_v42  ;;  %v281_v0 = vadd.f32 %v280_v55, %v279_v12  ;;  %v297_v21 = vmul.f32 %v296_v27, %v266_v25  ;;  %p520_p1 = pnand %p519_p0, %p513_p11 }
  0x4f   :  { %v285_v3 = vadd.f32 %v284_v4, %v283_v45  ;;  %v289_v6 = vadd.f32 %v288_v60, %v287_v13  ;;  %v300_v7 = vmul.f32 %v299_v23, %v266_v25  ;;  %v303_v14 = vmul.f32 %v302_v31, %v266_v25 }
  0x50   :  { %v292_v22 = vadd.f32 %v291_v17, %v273_v59  ;;  %v295_v26 = vadd.f32 %v294_v18, %v277_v63  ;;  %v298_v15 = vadd.f32 %v297_v21, %v281_v0  ;;  %v306_v20 = vmul.f32 %v305_v28, %v267_v5 }
  0x51   :  { %v301_v30 = vadd.f32 %v300_v7, %v285_v3  ;;  %v304_v34 = vadd.f32 %v303_v14, %v289_v6  ;;  %v309_v27 = vmul.f32 %v308_v29, %v267_v5  ;;  %v312_v35 = vmul.f32 %v311_v36, %v267_v5 }
  0x52   :  { %v307_v23 = vadd.f32 %v306_v20, %v292_v22  ;;  %v315_v31 = vmul.f32 %v314_v37, %v267_v5  ;;  %v318_v39 = vmul.f32 %v317_v41, %v267_v5  ;;  %v321_v40 = vmul.f32 %v320_v53, %v268_v32 }
  0x53   :  { %v310_v28 = vadd.f32 %v309_v27, %v295_v26  ;;  %v313_v43 = vadd.f32 %v312_v35, %v298_v15  ;;  %v324_v44 = vmul.f32 %v323_v50, %v268_v32  ;;  %v327_v48 = vmul.f32 %v326_v51, %v268_v32 }
  0x54   :  { %v316_v29 = vadd.f32 %v315_v31, %v301_v30  ;;  %v319_v49 = vadd.f32 %v318_v39, %v304_v34  ;;  %v322_v36 = vadd.f32 %v321_v40, %v307_v23  ;;  %v330_v38 = vmul.f32 %v329_v62, %v268_v32 }
  0x55   :  { %v325_v37 = vadd.f32 %v324_v44, %v310_v28  ;;  %v328_v52 = vadd.f32 %v327_v48, %v313_v43  ;;  %v333_v41 = vmul.f32 %v332_v8, %v268_v32  ;;  %v335_v53 = vstv %s904_s1 }
  0x56   :  { %v331_v46 = vadd.f32 %v330_v38, %v316_v29  ;;  %v336_v47 = vmul.f32 %v335_v53, %v896_v9  ;;  %v338_v56 = vstv %s914_s14  ;;  %v341_v50 = vstv %s916_s15 }
  0x57   :  { %v334_v57 = vadd.f32 %v333_v41, %v319_v49  ;;  %v339_v61 = vmul.f32 %v338_v56, %v896_v9  ;;  %v342_v51 = vmul.f32 %v341_v50, %v896_v9  ;;  %v344_v62 = vstv %s920_s16 }
  0x58   :  { %v337_v1 = vadd.f32 %v336_v47, %v322_v36  ;;  %v345_v54 = vmul.f32 %v344_v62, %v896_v9  ;;  %v347_v2 = vstv %s926_s17  ;;  %v355_v19 = vstv %s930_s18 }
  0x59   :  { %v340_v10 = vadd.f32 %v339_v61, %v325_v37  ;;  %v343_v11 = vadd.f32 %v342_v51, %v328_v52  ;;  %v348_v16 = vmul.f32 %v347_v2, %v896_v9  ;;  %v357_v24 = vstv %s938_s20 }
  0x5a   :  { %v346_v55 = vadd.f32 %v345_v54, %v331_v46  ;;  %v350_v58 = vmax.f32 %v337_v1, 0.0  ;;  %v359_v25 = vstv %s936_s19  ;;  %v362_v60 = vstv %s940_s21 }
  0x5b   :  { %v349_v4 = vadd.f32 %v348_v16, %v334_v57  ;;  %v351_v5 = vmax.f32 %v340_v10, 0.0  ;;  %v352_v32 = vmax.f32 %v343_v11, 0.0  ;;  %v365_v12 = vstv %s942_s22 }
  0x5c   :  { %v353_v8 = vmax.f32 %v346_v55, 0.0  ;;  %v356_v33 = vmul.f32 %v355_v19, %v350_v58  ;;  %v368_v18 = vstv %s948_s23 }
  0x5d   :  { %v360_v42 = vmul.f32 %v359_v25, %v351_v5  ;;  %v354_v45 = vmax.f32 %v349_v4, 0.0  ;;  %v363_v17 = vmul.f32 %v362_v60, %v352_v32 }
  0x5e   :  { %v358_v13 = vadd.f32 %v357_v24, %v356_v33  ;;  %v366_v9 = vmul.f32 %v365_v12, %v353_v8 }
  0x5f   :  { %v369_v0 = vmul.f32 %v368_v18, %v354_v45 }
  0x60   :  { %v361_v59 = vadd.f32 %v360_v42, %v358_v13 }
  0x62   :  { %v364_v63 = vadd.f32 %v363_v17, %v361_v59 }
  0x64   :  { %v367_v21 = vadd.f32 %v366_v9, %v364_v63 }
  0x66   :  { %v370_v3 = vadd.f32 %v369_v0, %v367_v21 }
  0x68   :  { %371 = vst [vmem:[#allocation7] sm:$0xff] %v370_v3 }
  0x69   :  { %523 = shalt.err (!%p520_p1)
}
  0x6a   :  { %s524_s0 = scalar_lea.hbm %s976_s2, 128 }
  0x6b   :  { %p525_p2 = scmp.ne.s32.totalorder %s976_s2, %s524_s0  ;;  %p528_p3 = scmp.lt.u32.totalorder %s524_s0, %s976_s2 }
  0x6d   :  { %p530_p4 = pnand %p528_p3, %p525_p2 }
  0x6f   :  { %533 = shalt.err (!%p530_p4)
}
  0x70   :  { %381 = dma.vmem_to_hbm [thread:$0]  %s379_s25, 128, %s976_s2, [#allocation4]  }
  0x71   :  { %538 = dma.done.wait [#allocation4], 128  }
  0x72   :  { %539 = vsyncadd [#allocation4], 4294967168 }
  0x73   :  { %385 = vsyncpa [#allocation3], 1 }
  0x74   :  { %386 = vsyncpa [#allocation4], 1 }
  0x75   :  { %387 = vsyncpa [#allocation5], 1 }

</bundles_post_ra>
